<compile_context>
chip_gen: v7x
topology: tpu7x:2x2x1
jax: 0.10.0
libtpu: 0.0.40
codegen_flags: <defaults>
</compile_context>

<pallas_src>
import jax
import jax.numpy as jnp
from jax.experimental import pallas as pl
from jax.experimental.pallas import tpu as pltpu


# ---------------------------------------------------------------------------
# Kernel
# ---------------------------------------------------------------------------
def _moe_grouped_kernel(gid_ref, x_ref, gu_ref, dw_ref, o_ref):
    """One (token-tile, F-tile) grid step of the grouped MoE SwiGLU FFN.

    gid_ref: (n_tiles,) int32 scalar-prefetch (SMEM) per-tile expert id; only
             used by the index_maps.
    x_ref  : (TM, D)       bf16  token tile (all rows routed to one expert)
    gu_ref : (1, D, 2*TF)  bf16  fused [gate_tile || up_tile] of that expert
    dw_ref : (1, TF, D)    bf16  down_proj tile of that expert
    o_ref  : (TM, D)       f32   output tile, accumulated over the F axis

    CORRECTNESS NOTE: accumulating into o_ref is only valid because the F axis
    is the innermost grid axis, is marked "arbitrary", and the output block
    index is constant along it (the block stays VMEM resident between f
    steps).  Do not reorder the grid or mark the F axis "parallel".
    """
    f = pl.program_id(1)

    x = x_ref[...]                                                    # (TM, D) bf16
    gu = jnp.dot(x, gu_ref[0], preferred_element_type=jnp.float32)    # (TM, 2*TF) f32
    tf = gu.shape[-1] // 2
    gate = gu[:, :tf]
    up = gu[:, tf:]
    gate = gate * jax.nn.sigmoid(gate)                                # SiLU (EUP)
    hidden = (gate * up).astype(dw_ref.dtype)                         # (TM, TF) bf16
    contrib = jnp.dot(hidden, dw_ref[0], preferred_element_type=jnp.float32)

    @pl.when(f == 0)
    def _():
        o_ref[...] = contrib

    @pl.when(f != 0)
    def _():
        o_ref[...] += contrib


# ---------------------------------------------------------------------------
# Chip-aware tiling helpers
# ---------------------------------------------------------------------------
def _vmem_capacity_bytes():
    try:
        return int(pltpu.get_tpu_info().vmem_capacity_bytes)
    except Exception:
        return 64 * 1024 * 1024  # conservative default (v7x per-TensorCore VMEM)


def pick_f_tile(model_dim, ff_dim, token_tile=256, vmem_bytes=None):
    """Largest 128-aligned F tile that divides ff_dim while keeping ALL per-step
    buffers (double-buffered weight tiles, x/out blocks, in-kernel f32
    intermediates) inside a chip-aware VMEM budget."""
    if vmem_bytes is None:
        vmem_bytes = _vmem_capacity_bytes()
    budget = int(vmem_bytes * 0.55)
    D, TM = model_dim, token_tile
    fixed = 2 * TM * D * 2 + 2 * TM * D * 4          # x (bf16) + out (f32), double-buffered
    smallest = None
    for tf in (2048, 1024, 512, 256, 128):           # descending -> prefer TF >= 256
        if ff_dim % tf:
            continue
        smallest = tf
        weights = 2 * (D * 2 * tf + tf * D) * 2      # fused gu + down tiles, bf16, 2x buffered
        inter = TM * 2 * tf * 4 + TM * tf * 4 + TM * tf * 2
        if fixed + weights + inter <= budget:
            return tf
    if smallest is not None:
        return smallest
    # ff_dim has no 128-multiple divisor (tiny / odd F): use the whole F axis.
    # TODO(synk): pad ff_dim up to a multiple of 128 for large, oddly-sized F.
    return ff_dim


def prepare_expert_weights(gate_w, up_w, down_w, f_tile):
    """ONE-TIME preprocessing (hoisted out of the forward path): cast expert
    weights to bf16 and fuse gate/up per F tile so fused block f along the
    last axis is [gate_tile_f || up_tile_f]."""
    E, D, F = gate_w.shape
    nf = F // f_tile
    g = gate_w.astype(jnp.bfloat16).reshape(E, D, nf, f_tile)
    u = up_w.astype(jnp.bfloat16).reshape(E, D, nf, f_tile)
    fused_gu = jnp.stack([g, u], axis=3).reshape(E, D, nf * 2 * f_tile)
    return fused_gu, down_w.astype(jnp.bfloat16)


# ---------------------------------------------------------------------------
# Expert grouping (static shapes; padding rows are computed then discarded)
# ---------------------------------------------------------------------------
def _group_rows_by_expert(row_experts, n_rows, num_experts, group):
    """Pack rows (each row = a batch or a sequence sub-row, entirely routed to
    one expert) into groups of `group` rows that share an expert.

    Returns:
      src_for_slot  : (n_slots,)        source row for every packed slot
                      (pad slots point at row 0; their output is discarded)
      expert_of_tile: (n_slots//group,) expert id of every packed tile
      slot_of_row   : (n_rows,)         packed slot holding each original row
    """
    idx = row_experts.astype(jnp.int32)
    perm = jnp.argsort(idx).astype(jnp.int32)
    sorted_idx = idx[perm]
    counts = jnp.bincount(idx, length=num_experts).astype(jnp.int32)
    padded = ((counts + group - 1) // group) * group
    zero = jnp.zeros((1,), jnp.int32)
    starts_sorted = jnp.concatenate([zero, jnp.cumsum(counts)[:-1].astype(jnp.int32)])
    starts_padded = jnp.concatenate([zero, jnp.cumsum(padded)[:-1].astype(jnp.int32)])
    ends_padded = jnp.cumsum(padded).astype(jnp.int32)

    # Static worst case: every expert pads by up to (group - 1) rows.
    n_slots = -(-(n_rows + num_experts * (group - 1)) // group) * group

    rank = jnp.arange(n_rows, dtype=jnp.int32) - starts_sorted[sorted_idx]
    slot_of_sorted = starts_padded[sorted_idx] + rank

    src_for_slot = jnp.zeros((n_slots,), jnp.int32).at[slot_of_sorted].set(perm)
    tile_start = jnp.arange(n_slots // group, dtype=jnp.int32) * group
    expert_of_tile = jnp.clip(
        jnp.searchsorted(ends_padded, tile_start, side="right"),
        0, num_experts - 1).astype(jnp.int32)
    slot_of_row = jnp.zeros((n_rows,), jnp.int32).at[perm].set(slot_of_sorted)
    return src_for_slot, expert_of_tile, slot_of_row


# ---------------------------------------------------------------------------
# Forward
# ---------------------------------------------------------------------------
def moe_layer_forward(x, expert_indices, fused_gu, down_w, *, f_tile,
                      token_tile=256):
    """x: (B, S, D) float; expert_indices: (B,) int;
    fused_gu: (E, D, NF*2*TF) bf16 and down_w: (E, F, D) bf16 from
    prepare_expert_weights (pre-cast / pre-fused; do NOT rebuild per call)."""
    B, S, D = x.shape
    E, F, _ = down_w.shape
    TF = f_tile
    NF = F // TF
    out_dtype = x.dtype

    # ---- token tiling -------------------------------------------------------
    # Long sequences split into sub-rows (bounds x/out VMEM blocks, v7x-safe);
    # short sequences group several batches so the MXU M dim is ~token_tile.
    split = 1
    if S > token_tile:
        for cand in (token_tile, 128, 64, 32, 16, 8):
            if S % cand == 0:
                split = S // cand
                break
    S_sub = S // split
    n_rows = B * split
    G = max(1, min(token_tile // max(S_sub, 1), n_rows))
    while G > 1 and (G * S_sub) % 8 != 0:   # keep the token tile sublane-aligned
        G -= 1
    TM = G * S_sub
    # TODO(synk): pad odd token tiles (S_sub not a multiple of 8 with G == 1)
    # up to a multiple of 8 for full lane/sublane-dense stores.

    # ---- pack rows into same-expert token tiles -----------------------------
    row_experts = jnp.repeat(expert_indices.astype(jnp.int32), split)
    src_for_slot, expert_of_tile, slot_of_row = _group_rows_by_expert(
        row_experts, n_rows, E, G)
    n_slots = src_for_slot.shape[0]
    n_tiles = n_slots // G

    xb = x.astype(jnp.bfloat16).reshape(n_rows, S_sub, D)
    x_tok = xb[src_for_slot].reshape(n_slots * S_sub, D)        # (M_pad, D) bf16
    m_pad = n_slots * S_sub

    # ---- pallas call ---------------------------------------------------------
    grid_spec = pltpu.PrefetchScalarGridSpec(
        num_scalar_prefetch=1,
        grid=(n_tiles, NF),
        in_specs=[
            pl.BlockSpec((TM, D), lambda m, f, gid: (m, 0)),                 # tokens
            pl.BlockSpec((1, D, 2 * TF), lambda m, f, gid: (gid[m], 0, f)),  # [gate||up]
            pl.BlockSpec((1, TF, D), lambda m, f, gid: (gid[m], f, 0)),      # down
        ],
        out_specs=pl.BlockSpec((TM, D), lambda m, f, gid: (m, 0)),
    )

    vmem_cap = _vmem_capacity_bytes()
    cost = pl.CostEstimate(
        flops=6 * m_pad * D * F,
        transcendentals=m_pad * F,
        # One expert-weight stream per token tile (not per batch) + activations.
        bytes_accessed=n_tiles * 3 * D * F * 2 + m_pad * D * 2 + m_pad * D * 4,
    )

    out_tok = pl.pallas_call(
        _moe_grouped_kernel,
        out_shape=jax.ShapeDtypeStruct((m_pad, D), jnp.float32),
        grid_spec=grid_spec,
        compiler_params=pltpu.CompilerParams(
            dimension_semantics=("parallel", "arbitrary"),
            vmem_limit_bytes=min(int(vmem_cap * 0.75), 96 * 1024 * 1024),
        ),
        cost_estimate=cost,
    )(expert_of_tile, x_tok, fused_gu, down_w)

    # ---- unpack: drop pad rows and restore original batch order -------------
    out = out_tok.reshape(n_slots, S_sub, D)[slot_of_row]
    return out.reshape(B, S, D).astype(out_dtype)


# ---------------------------------------------------------------------------
# Pure-JAX reference (f32), matching the PyTorch forward
# ---------------------------------------------------------------------------
def moe_layer_ref(x, expert_indices, gate_w, up_w, down_w):
    def per_batch(xb, e):
        gate = xb @ gate_w[e]
        gate = gate * jax.nn.sigmoid(gate)
        up = xb @ up_w[e]
        return (gate * up) @ down_w[e]
    return jax.vmap(per_batch)(x, expert_indices)


if __name__ == "__main__":
    # Small shapes consistent with the module: batch=2, seq=8, model_dim=32,
    # ff_dim=64, num_experts=4.
    B, S, D, F, E = 2, 8, 32, 64, 4

    key = jax.random.PRNGKey(0)
    k_x, k_g, k_u, k_d, k_idx = jax.random.split(key, 5)

    x = jax.random.normal(k_x, (B, S, D), dtype=jnp.float32)
    # Deterministic synthetic weights (stored as W.T of the PyTorch Linear).
    gate_w = jax.random.normal(k_g, (E, D, F), dtype=jnp.float32) * 0.05
    up_w = jax.random.normal(k_u, (E, D, F), dtype=jnp.float32) * 0.05
    down_w = jax.random.normal(k_d, (E, F, D), dtype=jnp.float32) * 0.05
    expert_indices = jax.random.randint(k_idx, (B,), 0, E, dtype=jnp.int32)

    # NOTE: the module's self.gate (router) Linear is never used in forward(),
    # so it is intentionally not materialized here.

    # One-time weight preprocessing (hoisted out of the forward path).
    f_tile = pick_f_tile(D, F)
    fused_gu, down_b = prepare_expert_weights(gate_w, up_w, down_w, f_tile)
    fused_gu = jax.block_until_ready(fused_gu)
    down_b = jax.block_until_ready(down_b)

    out = moe_layer_forward(x, expert_indices, fused_gu, down_b, f_tile=f_tile)
    out = jax.block_until_ready(out)

    ref = moe_layer_ref(x, expert_indices, gate_w, up_w, down_w)
    assert out.shape == (B, S, D)
    # bf16 weights/activations with f32 MXU accumulation -> loosened tolerance.
    assert jnp.allclose(out, ref, atol=1e-2, rtol=5e-2), "mismatch vs reference"

    print("KERNEL_OK")
</pallas_src>

<mosaic_0001>
module attributes {stable_mosaic.version = 11 : i64} {
  func.func @_moe_grouped_kernel(%arg0: i32, %arg1: i32, %arg2: memref<3xi32, #tpu.memory_space<smem>>, %arg3: memref<16x32xbf16, #tpu.memory_space<vmem>>, %arg4: memref<1x32x128xbf16, #tpu.memory_space<vmem>>, %arg5: memref<1x64x32xbf16, #tpu.memory_space<vmem>>, %arg6: memref<16x32xf32, #tpu.memory_space<vmem>>) attributes {dimension_semantics = [#tpu.dimension_semantics<parallel>, #tpu.dimension_semantics<arbitrary>], iteration_bounds = array<i64: 3, 1>, scalar_prefetch = 1 : i64, scratch_operands = 0 : i64, tpu.core_type = #tpu.core_type<tc>, window_params = [{transform_indices = @transform_0, window_bounds = array<i64: 16, 32>}, {transform_indices = @transform_1, window_bounds = array<i64: 1, 32, 128>}, {transform_indices = @transform_2, window_bounds = array<i64: 1, 64, 32>}, {transform_indices = @transform_3, window_bounds = array<i64: 16, 32>}]} {
    %c0 = arith.constant 0 : index
    %c0_0 = arith.constant 0 : index
    %0 = vector.load %arg3[%c0, %c0_0] : memref<16x32xbf16, #tpu.memory_space<vmem>>, vector<16x32xbf16>
    %c0_1 = arith.constant 0 : index
    %c0_2 = arith.constant 0 : index
    %c0_3 = arith.constant 0 : index
    %1 = vector.load %arg4[%c0_1, %c0_2, %c0_3] : memref<1x32x128xbf16, #tpu.memory_space<vmem>>, vector<1x32x128xbf16>
    %2 = vector.shape_cast %1 : vector<1x32x128xbf16> to vector<32x128xbf16>
    %cst = arith.constant dense<0.000000e+00> : vector<16x128xf32>
    %3 = tpu.matmul %0, %2, %cst {dimension_numbers = #tpu.dot_dimension_numbers<[1], [0], [0], [1], [0, 0, 1, 1], [], []>} : vector<16x32xbf16>, vector<32x128xbf16>, vector<16x128xf32> -> vector<16x128xf32>
    %4 = vector.extract_strided_slice %3 {offsets = [0, 0], sizes = [16, 64], strides = [1, 1]} : vector<16x128xf32> to vector<16x64xf32>
    %5 = vector.extract_strided_slice %3 {offsets = [0, 64], sizes = [16, 64], strides = [1, 1]} : vector<16x128xf32> to vector<16x64xf32>
    %6 = arith.negf %4 : vector<16x64xf32>
    %7 = math.exp %6 : vector<16x64xf32>
    %cst_4 = arith.constant 1.000000e+00 : f32
    %8 = vector.broadcast %cst_4 : f32 to vector<16x64xf32>
    %9 = arith.addf %8, %7 : vector<16x64xf32>
    %10 = arith.divf %8, %9 : vector<16x64xf32>
    %11 = arith.mulf %4, %10 : vector<16x64xf32>
    %12 = arith.mulf %11, %5 : vector<16x64xf32>
    %13 = arith.truncf %12 : vector<16x64xf32> to vector<16x64xbf16>
    %c0_5 = arith.constant 0 : index
    %c0_6 = arith.constant 0 : index
    %c0_7 = arith.constant 0 : index
    %14 = vector.load %arg5[%c0_5, %c0_6, %c0_7] : memref<1x64x32xbf16, #tpu.memory_space<vmem>>, vector<1x64x32xbf16>
    %15 = vector.shape_cast %14 : vector<1x64x32xbf16> to vector<64x32xbf16>
    %cst_8 = arith.constant dense<0.000000e+00> : vector<16x32xf32>
    %16 = tpu.matmul %13, %15, %cst_8 {dimension_numbers = #tpu.dot_dimension_numbers<[1], [0], [0], [1], [0, 0, 1, 1], [], []>} : vector<16x64xbf16>, vector<64x32xbf16>, vector<16x32xf32> -> vector<16x32xf32>
    %c0_i32 = arith.constant 0 : i32
    %17 = arith.cmpi eq, %arg1, %c0_i32 : i32
    %18 = arith.extui %17 : i1 to i32
    %c0_i32_9 = arith.constant 0 : i32
    %19 = arith.cmpi ne, %18, %c0_i32_9 : i32
    scf.if %19 {
      %c0_12 = arith.constant 0 : index
      %c0_13 = arith.constant 0 : index
      %23 = vector.load %arg6[%c0_12, %c0_13] : memref<16x32xf32, #tpu.memory_space<vmem>>, vector<16x32xf32>
      tpu.vector_store %arg6[%c0_12, %c0_13], %16 {strides = array<i32>} : memref<16x32xf32, #tpu.memory_space<vmem>>, vector<16x32xf32>,
    } else {
    }
    %c0_i32_10 = arith.constant 0 : i32
    %20 = arith.cmpi ne, %arg1, %c0_i32_10 : i32
    %21 = arith.extui %20 : i1 to i32
    %c0_i32_11 = arith.constant 0 : i32
    %22 = arith.cmpi ne, %21, %c0_i32_11 : i32
    scf.if %22 {
      %c0_12 = arith.constant 0 : index
      %c0_13 = arith.constant 0 : index
      %23 = vector.load %arg6[%c0_12, %c0_13] : memref<16x32xf32, #tpu.memory_space<vmem>>, vector<16x32xf32>
      %24 = arith.addf %23, %16 : vector<16x32xf32>
      %c0_14 = arith.constant 0 : index
      %c0_15 = arith.constant 0 : index
      %25 = vector.load %arg6[%c0_14, %c0_15] : memref<16x32xf32, #tpu.memory_space<vmem>>, vector<16x32xf32>
      tpu.vector_store %arg6[%c0_14, %c0_15], %24 {strides = array<i32>} : memref<16x32xf32, #tpu.memory_space<vmem>>, vector<16x32xf32>,
    } else {
    }
    return
  }
  func.func @transform_0(%arg0: i32, %arg1: i32, %arg2: memref<3xi32, #tpu.memory_space<smem>>) -> (i32, i32) {
    %c0_i32 = arith.constant 0 : i32
    %c0_i32_0 = arith.constant 0 : i32
    return %arg0, %c0_i32 : i32, i32
  }
  func.func @transform_1(%arg0: i32, %arg1: i32, %arg2: memref<3xi32, #tpu.memory_space<smem>>) -> (i32, i32, i32) {
    %0 = arith.index_cast %arg0 : i32 to index
    %1 = memref.load %arg2[%0] : memref<3xi32, #tpu.memory_space<smem>>
    %c0_i32 = arith.constant 0 : i32
    %c0_i32_0 = arith.constant 0 : i32
    return %1, %c0_i32, %arg1 : i32, i32, i32
  }
  func.func @transform_2(%arg0: i32, %arg1: i32, %arg2: memref<3xi32, #tpu.memory_space<smem>>) -> (i32, i32, i32) {
    %0 = arith.index_cast %arg0 : i32 to index
    %1 = memref.load %arg2[%0] : memref<3xi32, #tpu.memory_space<smem>>
    %c0_i32 = arith.constant 0 : i32
    %c0_i32_0 = arith.constant 0 : i32
    return %1, %arg1, %c0_i32 : i32, i32, i32
  }
  func.func @transform_3(%arg0: i32, %arg1: i32, %arg2: memref<3xi32, #tpu.memory_space<smem>>) -> (i32, i32) {
    %c0_i32 = arith.constant 0 : i32
    %c0_i32_0 = arith.constant 0 : i32
    return %arg0, %c0_i32 : i32, i32
  }
}

</mosaic_0001>

<bundles_post_ra>
// kernel: tpu_custom_call.1
= control target key start
LH: loop header
LB: loop body
LE: loop exit
PB: predicated region body
PF: predicated region fallthrough
CT: control target
= control target key end

     0   :  { %s782_s0 = inlined_call_operand.vmem [shape: s32[3], index: 0, kind: input, shape index: {}]   ;;  %s783_s1 = inlined_call_operand.vmem [shape: bf16[48,32], index: 1, kind: input, shape index: {}]   ;;  %s784_s2 = inlined_call_operand.vmem [shape: bf16[4,32,128], index: 2, kind: input, shape index: {}]   ;;  %s785_s3 = inlined_call_operand.vmem [shape: bf16[4,64,32], index: 3, kind: input, shape index: {}]   ;;  %s786_s4 = inlined_call_operand.vmem [shape: f32[48,32], index: 4, kind: output, shape index: {}]  }
   0x1   :  { %s9_s17 = sshll.u32 %s782_s0, 4  ;;  %s10_s17 = int_to_ptr.vmem [resolvable:$true] %s9_s17 }
   0x2   :  { %s661_s18 = scalar_lea.vmem %s10_s17, 16  ;;  %p666_p1 = scmp.lt.s32.totalorder %s10_s17, %s10_s17 }
   0x3   :  { %p662_p0 = scmp.ne.s32.totalorder %s10_s17, %s661_s18  ;;  %p667_p2 = scmp.lt.s32.totalorder %s661_s18, %s661_s18 }
   0x5   :  { %p668_p3 = por %p667_p2, %p666_p1 }
   0x7   :  { %p669_p4 = pnand %p668_p3, %p662_p0 }
   0x9   :  { %672 = shalt.err (!%p669_p4)  }
   0xa   :  { %s699_s19 = smov [#allocation3]  }
   0xb   :  { %12 = dma.vmem_to_smem %s10_s17, 16, %s699_s19, [#allocation2] }
   0xc   :  { %685 = dma.done.wait [#allocation2], 16 }
   0xd   :  { %686 = vsyncadd [#allocation2], 4294967280 }
   0xe   :  { %14 = sfence }
   0xf   :  { %s731_s20 = smov 0   ;;  %s733_s21 = smov 0  }
  0x10   :  { %s735_s22 = smov 0  }
  0x11 LB: > { %s32_s0 = sadd.s32 1, %s693_s21  ;;  %p566_p5 = scmp.ge.s32.totalorder %s697_s22, 1  ;;  %s697_s22 = sphi %s735_s22, %s20_s22   ;;  %s693_s21 = sphi %s733_s21, %s788_s21   ;;  %s689_s20 = sphi %s731_s20, %s787_s20  }
  0x12   : > { %p34_p6 = scmp.ge.s32.totalorder %s32_s0, 3  ;;  %p197_p7 = scmp.lt.s32.totalorder %s697_s22, 4 }
  0x14   : > { %s790_s0 = smov (%p34_p6, %s32_s0), 0  ;;  %p198_p8 = pnand %p566_p5, %p197_p7 }
  0x15   : > { %s246_s23 = sld [smem:[#allocation3 + %s689_s20]] (!%p198_p8)  ;;  %s567_s24 = sshll.u32 (!%p198_p8), %s689_s20, 1  ;;  %v700_v0 = vmov (!%p198_p8), 0.0   ;;  %vm701_vm0 = vmmov (!%p198_p8), 0   ;;  %vm298_vm1 = vcmask (!%p198_p8), 261120   ;;  %vm400_vm2 = vcmask (!%p198_p8), 523264  }
  0x16   : > { %201 = sbr.rel (%p198_p8) target bundleno = 590 (0x24e), region = 32  ;;  %598 = vmatprep.subr.bf16.mxu0 (!%p198_p8), %v700_v0  ;;  %602 = vmatprep.mubr.msk.bf16.mxu0 (!%p198_p8), %vm701_vm0, %v700_v0  ;;  %p241_p9 = scmp.lt.s32.totalorder (!%p198_p8), %s567_s24, 5 }
  0x17   : > { %606 = vmatprep.subr.bf16.mxu1 (!%p198_p8), %v700_v0  ;;  %614 = vmatprep.mubr.msk.bf16.mxu1 (!%p198_p8), %vm701_vm0, %v700_v0  ;;  %s256_s7 = sld [smem:[#allocation3 + %s689_s20]] (!%p198_p8)  ;;  %s702_s12 = smov (!%p198_p8), 64  }
  0x1b   : > { %p247_p10 = scmp.lt.s32.totalorder (!%p198_p8), %s246_s23, 3 }
  0x1d   : > { %s792_s24 = smov (!%p241_p9, %s567_s24), 5  ;;  %s794_s23 = smov (!%p247_p10, %s246_s23), 3 }
  0x1e   : > { %s568_s25 = sshll.u32 %s792_s24, 2  ;;  %s588_s29 = sshll.u32 %s794_s23, 4 }
  0x1f   : > { %s244_s28 = scalar_lea.vmem %s783_s1, %s568_s25  ;;  %s254_s6 = scalar_lea.vmem %s784_s2, %s588_s29 }
  0x20   : > { %v646_v1 = vld [vmem:[%s254_s6] sm:$0xff]   ;;  %v647_v2 = vld [vmem:[%s254_s6 + $0x8] sm:$0xff]   ;;  %p258_p11 = scmp.lt.s32.totalorder %s256_s7, 3  ;;  %s574_s13 = sshll.u32 %s792_s24, 3 }
  0x21   : > { %599 = vmatpush3.bf16.msra.mxu0 %v646_v1  ;;  %v648_v3 = vld [vmem:[%s244_s28] sm:$0xff]   ;;  %s272_s16 = scalar_lea.vmem %s786_s4, %s574_s13 }
  0x22   : > { %600 = vmatprep.subr.bf16.mxu0 %v700_v0  ;;  %s796_s7 = smov (!%p258_p11, %s256_s7), 3 }
  0x23   : > { %s589_s8 = sshll.u32 %s796_s7, 5 }
  0x24   : > { %s265_s11 = scalar_lea.vmem %s785_s3, %s589_s8 }
  0x25   : > { %601 = vmatpush3.bf16.msra.mxu0 %v647_v2  ;;  %v649_v4 = vld [vmem:[%s265_s11] sm:$0xff]   ;;  %v650_v5 = vld [vmem:[%s265_s11 + $0x8] sm:$0xff]   ;;  %v651_v6 = vld [vmem:[%s265_s11 + $0x10] sm:$0xff]  }
  0x26   : > { %607 = vmatpush3.bf16.msra.mxu1 %v649_v4  ;;  %v652_v7 = vld [vmem:[%s265_s11 + $0x18] sm:$0xff]  }
  0x27   : > { %608 = vmatprep.subr.bf16.mxu1 %v700_v0 }
  0x28   : > { %603 = vmatmul.mubr.msk.bf16.vlgmr.msra.gmra.mrb[0].mxu0 %vm298_vm1, %v648_v3 }
  0x2a   : > { %609 = vmatpush3.bf16.msra.mxu1 %v650_v5 }
  0x2b   : > { %610 = vmatprep.subr.bf16.mxu1 %v700_v0 }
  0x2e   : > { %611 = vmatpush3.bf16.msra.mxu1 %v651_v6 }
  0x2f   : > { %612 = vmatprep.subr.bf16.mxu1 %v700_v0 }
  0x32   : > { %613 = vmatpush3.bf16.msra.mxu1 %v652_v7 }
  0xfb   : > { %v336_v8 = vpop.f32.mrb[0].mxu0 }
  0xfc   : > { %359 = vrot.lane.b32.xlu0 %v336_v8, %s702_s12  ;;  %v604_v9 = vpop.f32.mrb[1].mxu0  ;;  %v579_v12 = vmul.f32 -1.442695, %v336_v8 }
  0xfd   : > { %v339_v10 = vpop.f32.mrb[2].mxu0 }
  0xfe   : > { %v605_v11 = vpop.f32.mrb[3].mxu0  ;;  %v580_v13 = vmul.f32 -1.442695, %v339_v10  ;;  %653 = vpow2.f32 %v579_v12 }
 0x100   : > { %361 = vrot.lane.b32.xlu0 %v339_v10, %s702_s12  ;;  %655 = vpow2.f32 %v580_v13 }
 0x108   : > { %v654_v14 = vpop.eup %653 }
 0x109   : > { %v349_v16 = vadd.f32 1.0, %v654_v14 }
 0x10a   : > { %v656_v15 = vpop.eup %655 }
 0x10b   : > { %v350_v17 = vadd.f32 1.0, %v656_v15  ;;  %657 = vrcp.f32 %v349_v16 }
 0x10d   : > { %659 = vrcp.f32 %v350_v17 }
 0x115   : > { %v658_v18 = vpop.eup %657 }
 0x116   : > { %v355_v21 = vmul.f32 %v658_v18, %v336_v8 }
 0x117   : > { %v660_v19 = vpop.eup %659 }
 0x118   : > { %v356_v22 = vmul.f32 %v660_v19, %v339_v10 }
 0x16e   : > { %v360_v20 = vpop.permute.xlu0 %359 }
 0x16f   : > { %v365_v24 = vmul.f32 %v360_v20, %v355_v21 }
 0x172   : > { %v362_v23 = vpop.permute.xlu0 %361 }
 0x173   : > { %v366_v25 = vmul.f32 %v362_v23, %v356_v22 }
 0x175   : > { %v367_v26 = vpack.c.bf16 %v366_v25, %v365_v24 }
 0x177   : > { %615 = vmatmul.mubr.msk.bf16.vlgmr.msra.gmra.mrb[0].mxu1 %vm400_vm2, %v367_v26 }
 0x24a   : > { %v438_v27 = vpop.f32.mrb[0].mxu1 }
 0x24b   : > { %449 = vst.msk [vmem:[%s272_s16] sm:$0xff] %vm298_vm1, %v438_v27  ;;  %v616_v28 = vpop.f32.mrb[1].mxu1 }
 0x24c   : > { %v441_v29 = vpop.f32.mrb[2].mxu1 }
 0x24d   : > { %450 = vst.msk [vmem:[%s272_s16 + $0x8] sm:$0xff] %vm298_vm1, %v441_v29  ;;  %v617_v30 = vpop.f32.mrb[3].mxu1 }
 0x24e PF: > { %s20_s22 = sadd.s32 1, %s697_s22   ;;  %s787_s20 = smov %s693_s21 }
 0x24f   : > { %p17_p12 = scmp.ge.s32.totalorder %s20_s22, 5   ;;  %s788_s21 = smov %s790_s0 }
 0x251   :  { %19 = sbr.rel (!%p17_p12) target bundleno = 17 (0x11), region = 76 }

</bundles_post_ra>
